<compile_context>
chip_gen: v6e
topology: v6e:2x2x1
jax: 0.10.0
libtpu: 0.0.40
codegen_flags: <defaults>
</compile_context>

<pallas_src>
import math

import jax
import jax.numpy as jnp
from jax.experimental import pallas as pl
from jax.experimental.pallas import tpu as pltpu

_GELU_C = math.sqrt(2.0 / math.pi)


def _gelu_f32(z):
    """Tanh-approximation GELU (matches the PyTorch GELU module), f32 math."""
    c = jnp.float32(_GELU_C)
    return jnp.float32(0.5) * z * (
        jnp.float32(1.0) + jnp.tanh(c * (z + jnp.float32(0.044715) * z * z * z))
    )


def _ffn_kernel(x_ref, w1_ref, b1_ref, w2_ref, b2_ref, o_ref, acc_ref):
    # grid = (row_tiles, hidden_tiles); hidden axis (last) is the reduction.
    h = pl.program_id(1)

    @pl.when(h == 0)
    def _():
        # Seed the accumulator with b2: removes the extra full (tm, emb)
        # read-add pass in the epilogue.
        acc_ref[...] = jnp.broadcast_to(
            b2_ref[...].astype(jnp.float32), acc_ref.shape
        )

    # First linear (partial, over this hidden tile) + bias.  MXU operands are
    # whatever dtype the wrapper streamed (bf16 by default); accumulate in f32.
    z = jnp.dot(x_ref[...], w1_ref[...], preferred_element_type=jnp.float32)
    z = z + b1_ref[...].astype(jnp.float32)

    # GELU fused on the f32 partial activation (never written to HBM).
    g = _gelu_f32(z)

    # Second linear: accumulate this hidden tile's contribution.
    acc_ref[...] += jnp.dot(
        g.astype(w2_ref.dtype), w2_ref[...], preferred_element_type=jnp.float32
    )

    @pl.when(h == pl.num_programs(1) - 1)
    def _():
        o_ref[...] = acc_ref[...].astype(o_ref.dtype)


def _round_up(x, m):
    return ((x + m - 1) // m) * m


def _vmem_capacity_bytes():
    """Physical VMEM of the local TensorCore; conservative fallback = 64 MiB
    (v7x per-TC size, also safe on v5e/v6e)."""
    try:
        return int(pltpu.get_tpu_info().vmem_capacity_bytes)
    except Exception:  # query unavailable -> be conservative
        return 64 * 1024 * 1024


def _tm_candidates(rows, cap=512):
    """Row-tile candidates (descending): multiples of 8, never larger than the
    (rounded-up) row count, capped at `cap`."""
    if rows <= 8:
        return [rows]
    top = min(_round_up(rows, 8), max(cap, 8))
    base = [512, 384, 256, 128, 64, 32, 16, 8]
    return sorted({top, *[t for t in base if t <= top]}, reverse=True)


def _divisor_tiles(hidden, cap=1024):
    """Hidden-tile candidates: divisors of `hidden` that are multiples of 128
    (lane constraint) and <= cap, preferring multiples of 256 (v6e/v7x MXU),
    descending within each preference class."""
    divs = set()
    d = 1
    while d * d <= hidden:
        if hidden % d == 0:
            divs.add(d)
            divs.add(hidden // d)
        d += 1
    ok = [d for d in divs if d <= cap and d % 128 == 0]
    pref = sorted([d for d in ok if d % 256 == 0], reverse=True)
    rest = sorted([d for d in ok if d % 256 != 0], reverse=True)
    return pref + rest


def _pick_tiles(rows, emb, hidden, sx, sw, so, budget):
    """Pick (tm, th) so the double-buffered tiles + f32 accumulator fit `budget`."""

    def usage(tm, th):
        x_t = 2 * tm * emb * sx          # double-buffered x tile
        w_t = 2 * 2 * emb * th * sw      # double-buffered W1 + W2 tiles
        b_t = 2 * (th + emb) * 4         # biases (f32, tiny)
        o_t = 2 * tm * emb * so          # double-buffered output tile
        acc = tm * emb * 4               # f32 accumulator scratch
        return x_t + w_t + b_t + o_t + acc

    tm_cands = _tm_candidates(rows)

    # Fast path: weights fully resident (th = hidden) -> W1/W2 DMA'd once.
    resident_min_tm = min(tm_cands[0], 256)
    for tm_c in tm_cands:
        if tm_c < resident_min_tm:
            break
        if usage(tm_c, hidden) <= budget:
            return tm_c, hidden

    # Streamed path: prefer big row tiles (amortize weight re-streaming), then
    # big hidden tiles (fewer f32-accumulator read-modify-write passes).
    th_cands = _divisor_tiles(hidden, cap=1024)
    if not th_cands:
        th_cands = [hidden]  # no multiple-of-128 divisor: full-dim block only
    for tm_c in tm_cands:
        for th_c in th_cands:
            if usage(tm_c, th_c) <= budget:
                return tm_c, th_c
    return tm_cands[-1], th_cands[-1]  # smallest everything; best effort


def feed_forward(x, w1, b1, w2, b2, *, use_bf16_mxu=True):
    """Computes (gelu(x @ w1 + b1)) @ w2 + b2 with one fused Pallas kernel.

    x:  [..., emb]
    w1: [emb, hidden], b1: [hidden]
    w2: [hidden, emb], b2: [emb]
    """
    orig_shape = x.shape
    emb = orig_shape[-1]
    hidden = w1.shape[1]
    assert w1.shape == (emb, hidden) and w2.shape == (hidden, emb)
    assert b1.shape == (hidden,) and b2.shape == (emb,)

    out_dtype = x.dtype
    x2d = x.reshape(-1, emb)
    rows = x2d.shape[0]

    # MXU feeding dtype: bf16 gives 3-8x MXU throughput on all generations and
    # halves the streamed-weight HBM/VMEM footprint.  GELU + accumulation stay
    # f32 in-kernel.  Disable for exact-f32 numerics.
    if use_bf16_mxu and jnp.dtype(x.dtype) == jnp.float32:
        stream_dtype = jnp.bfloat16
    else:
        stream_dtype = x.dtype

    x2d = x2d.astype(stream_dtype)
    w1s = w1.astype(stream_dtype)
    w2s = w2.astype(stream_dtype)
    b1_2d = b1.reshape(1, hidden).astype(jnp.float32)
    b2_2d = b2.reshape(1, emb).astype(jnp.float32)

    sx = sw = jnp.dtype(stream_dtype).itemsize
    so = jnp.dtype(out_dtype).itemsize

    # Per-generation VMEM budget (v5e/v6e: ~96 MiB, v7x: ~48 MiB after the
    # 0.75 limit) and tile derivation against 90% of it (headroom for
    # compiler-internal scratch / semaphores).
    vmem_cap = _vmem_capacity_bytes()
    vmem_limit = int(vmem_cap * 0.75)
    budget = int(vmem_limit * 0.9)

    tm, th = _pick_tiles(rows, emb, hidden, sx, sw, so, budget)

    # v7x has 2 TensorCores: when the weights are resident (splitting rows is
    # ~free) make sure the "parallel" row axis has at least 2 tiles.
    if th == hidden and rows >= 16 and pl.cdiv(rows, tm) == 1:
        tm = max(8, _round_up(-(-rows // 2), 8))

    assert hidden % th == 0, (hidden, th)
    n_row_tiles = pl.cdiv(rows, tm)
    grid = (n_row_tiles, hidden // th)

    # Weight traffic: once total when resident, once per row tile when streamed.
    weight_passes = 1 if th == hidden else n_row_tiles
    cost = pl.CostEstimate(
        flops=4 * rows * emb * hidden,                    # two matmuls
        transcendentals=rows * hidden,                    # tanh per hidden elem
        bytes_accessed=(x2d.size * sx
                        + weight_passes * (w1s.size + w2s.size) * sw
                        + (b1.size + b2.size) * 4
                        + rows * emb * so),
    )

    out = pl.pallas_call(
        _ffn_kernel,
        out_shape=jax.ShapeDtypeStruct((rows, emb), out_dtype),
        grid_spec=pltpu.PrefetchScalarGridSpec(
            num_scalar_prefetch=0,
            grid=grid,
            in_specs=[
                pl.BlockSpec((tm, emb), lambda i, h: (i, 0)),   # x rows
                pl.BlockSpec((emb, th), lambda i, h: (0, h)),   # W1 hidden tile
                pl.BlockSpec((1, th), lambda i, h: (0, h)),     # b1 hidden tile
                pl.BlockSpec((th, emb), lambda i, h: (h, 0)),   # W2 hidden tile
                pl.BlockSpec((1, emb), lambda i, h: (0, 0)),    # b2 (resident)
            ],
            out_specs=pl.BlockSpec((tm, emb), lambda i, h: (i, 0)),
            scratch_shapes=[pltpu.VMEM((tm, emb), jnp.float32)],
        ),
        compiler_params=pltpu.CompilerParams(
            dimension_semantics=("parallel", "arbitrary"),
            vmem_limit_bytes=vmem_limit,
        ),
        cost_estimate=cost,
    )(x2d, w1s, b1_2d, w2s, b2_2d)

    return out.reshape(orig_shape)


def feed_forward_ref(x, w1, b1, w2, b2):
    xf = x.astype(jnp.float32)
    h = jnp.dot(xf, w1.astype(jnp.float32), precision="highest") + b1.astype(jnp.float32)
    g = 0.5 * h * (1.0 + jnp.tanh(_GELU_C * (h + 0.044715 * h ** 3)))
    out = jnp.dot(g, w2.astype(jnp.float32), precision="highest") + b2.astype(jnp.float32)
    return out.astype(x.dtype)


if __name__ == "__main__":
    key = jax.random.PRNGKey(0)
    k_x, k_w1, k_b1, k_w2, k_b2 = jax.random.split(key, 5)

    # Small transformer-like shapes: batch=2, seq=8, emb_dim=32 -> hidden=128.
    batch, seq, emb = 2, 8, 32
    hidden = 4 * emb

    x = jax.random.normal(k_x, (batch, seq, emb), dtype=jnp.float32)
    w1 = jax.random.normal(k_w1, (emb, hidden), dtype=jnp.float32) * 0.05
    b1 = jax.random.normal(k_b1, (hidden,), dtype=jnp.float32) * 0.05
    w2 = jax.random.normal(k_w2, (hidden, emb), dtype=jnp.float32) * 0.05
    b2 = jax.random.normal(k_b2, (emb,), dtype=jnp.float32) * 0.05

    ref = feed_forward_ref(x, w1, b1, w2, b2)

    # Exact-precision path (f32 MXU operands): tight tolerance.
    out_f32 = feed_forward(x, w1, b1, w2, b2, use_bf16_mxu=False)
    jax.block_until_ready(out_f32)
    assert out_f32.shape == x.shape and out_f32.dtype == x.dtype
    err_f32 = float(jnp.max(jnp.abs(out_f32 - ref)))
    assert jnp.allclose(out_f32, ref, atol=1e-4, rtol=1e-4), err_f32

    # Default fast path (bf16 MXU operands, f32 GELU + accumulation).
    out = feed_forward(x, w1, b1, w2, b2)
    jax.block_until_ready(out)
    assert out.shape == x.shape and out.dtype == x.dtype
    err_bf16 = float(jnp.max(jnp.abs(out - ref)))
    assert jnp.allclose(out, ref, atol=3e-2, rtol=3e-2), err_bf16

    print("KERNEL_OK")
</pallas_src>

<mosaic_0001>
module attributes {stable_mosaic.version = 11 : i64} {
  func.func @_ffn_kernel(%arg0: i32, %arg1: i32, %arg2: memref<8x32xf32, #tpu.memory_space<vmem>>, %arg3: memref<32x128xf32, #tpu.memory_space<vmem>>, %arg4: memref<1x128xf32, #tpu.memory_space<vmem>>, %arg5: memref<128x32xf32, #tpu.memory_space<vmem>>, %arg6: memref<1x32xf32, #tpu.memory_space<vmem>>, %arg7: memref<8x32xf32, #tpu.memory_space<vmem>>, %arg8: memref<8x32xf32, #tpu.memory_space<vmem>>) attributes {dimension_semantics = [#tpu.dimension_semantics<parallel>, #tpu.dimension_semantics<arbitrary>], iteration_bounds = array<i64: 2, 1>, scalar_prefetch = 0 : i64, scratch_operands = 1 : i64, tpu.core_type = #tpu.core_type<tc>, window_params = [{transform_indices = @transform_0, window_bounds = array<i64: 8, 32>}, {transform_indices = @transform_1, window_bounds = array<i64: 32, 128>}, {transform_indices = @transform_2, window_bounds = array<i64: 1, 128>}, {transform_indices = @transform_3, window_bounds = array<i64: 128, 32>}, {pipeline_mode = #tpu.pipeline_mode<synchronous>, transform_indices = @transform_4, window_bounds = array<i64: 1, 32>}, {transform_indices = @transform_5, window_bounds = array<i64: 8, 32>}]} {
    %c0_i32 = arith.constant 0 : i32
    %0 = arith.cmpi eq, %arg1, %c0_i32 : i32
    %1 = arith.extui %0 : i1 to i32
    %c0_i32_0 = arith.constant 0 : i32
    %2 = arith.cmpi ne, %1, %c0_i32_0 : i32
    scf.if %2 {
      %c0_19 = arith.constant 0 : index
      %c0_20 = arith.constant 0 : index
      %30 = vector.load %arg6[%c0_19, %c0_20] : memref<1x32xf32, #tpu.memory_space<vmem>>, vector<1x32xf32>
      %31 = vector.shape_cast %30 : vector<1x32xf32> to vector<1x32xf32>
      %32 = vector.broadcast %31 : vector<1x32xf32> to vector<8x32xf32>
      %c0_21 = arith.constant 0 : index
      %c0_22 = arith.constant 0 : index
      %33 = vector.load %arg8[%c0_21, %c0_22] : memref<8x32xf32, #tpu.memory_space<vmem>>, vector<8x32xf32>
      tpu.vector_store %arg8[%c0_21, %c0_22], %32 {strides = array<i32>} : memref<8x32xf32, #tpu.memory_space<vmem>>, vector<8x32xf32>,
    } else {
    }
    %c0 = arith.constant 0 : index
    %c0_1 = arith.constant 0 : index
    %3 = vector.load %arg2[%c0, %c0_1] : memref<8x32xf32, #tpu.memory_space<vmem>>, vector<8x32xf32>
    %c0_2 = arith.constant 0 : index
    %c0_3 = arith.constant 0 : index
    %4 = vector.load %arg3[%c0_2, %c0_3] : memref<32x128xf32, #tpu.memory_space<vmem>>, vector<32x128xf32>
    %cst = arith.constant dense<0.000000e+00> : vector<8x128xf32>
    %5 = tpu.matmul %3, %4, %cst {dimension_numbers = #tpu.dot_dimension_numbers<[1], [0], [0], [1], [0, 0, 1, 1], [], []>} : vector<8x32xf32>, vector<32x128xf32>, vector<8x128xf32> -> vector<8x128xf32>
    %c0_4 = arith.constant 0 : index
    %c0_5 = arith.constant 0 : index
    %6 = vector.load %arg4[%c0_4, %c0_5] : memref<1x128xf32, #tpu.memory_space<vmem>>, vector<1x128xf32>
    %7 = vector.broadcast %6 : vector<1x128xf32> to vector<8x128xf32>
    %8 = arith.addf %5, %7 : vector<8x128xf32>
    %cst_6 = arith.constant 5.000000e-01 : f32
    %9 = vector.broadcast %cst_6 : f32 to vector<8x128xf32>
    %10 = arith.mulf %9, %8 : vector<8x128xf32>
    %cst_7 = arith.constant 4.471500e-02 : f32
    %11 = vector.broadcast %cst_7 : f32 to vector<8x128xf32>
    %12 = arith.mulf %11, %8 : vector<8x128xf32>
    %13 = arith.mulf %12, %8 : vector<8x128xf32>
    %14 = arith.mulf %13, %8 : vector<8x128xf32>
    %15 = arith.addf %8, %14 : vector<8x128xf32>
    %cst_8 = arith.constant 0.797884583 : f32
    %16 = vector.broadcast %cst_8 : f32 to vector<8x128xf32>
    %17 = arith.mulf %16, %15 : vector<8x128xf32>
    %18 = math.tanh %17 : vector<8x128xf32>
    %cst_9 = arith.constant 1.000000e+00 : f32
    %19 = vector.broadcast %cst_9 : f32 to vector<8x128xf32>
    %20 = arith.addf %19, %18 : vector<8x128xf32>
    %21 = arith.mulf %10, %20 : vector<8x128xf32>
    %c0_10 = arith.constant 0 : index
    %c0_11 = arith.constant 0 : index
    %22 = vector.load %arg8[%c0_10, %c0_11] : memref<8x32xf32, #tpu.memory_space<vmem>>, vector<8x32xf32>
    %c0_12 = arith.constant 0 : index
    %c0_13 = arith.constant 0 : index
    %23 = vector.load %arg5[%c0_12, %c0_13] : memref<128x32xf32, #tpu.memory_space<vmem>>, vector<128x32xf32>
    %cst_14 = arith.constant dense<0.000000e+00> : vector<8x32xf32>
    %24 = tpu.matmul %21, %23, %cst_14 {dimension_numbers = #tpu.dot_dimension_numbers<[1], [0], [0], [1], [0, 0, 1, 1], [], []>} : vector<8x128xf32>, vector<128x32xf32>, vector<8x32xf32> -> vector<8x32xf32>
    %25 = arith.addf %22, %24 : vector<8x32xf32>
    %c0_15 = arith.constant 0 : index
    %c0_16 = arith.constant 0 : index
    %26 = vector.load %arg8[%c0_15, %c0_16] : memref<8x32xf32, #tpu.memory_space<vmem>>, vector<8x32xf32>
    tpu.vector_store %arg8[%c0_15, %c0_16], %25 {strides = array<i32>} : memref<8x32xf32, #tpu.memory_space<vmem>>, vector<8x32xf32>,
    %c0_i32_17 = arith.constant 0 : i32
    %27 = arith.cmpi eq, %arg1, %c0_i32_17 : i32
    %28 = arith.extui %27 : i1 to i32
    %c0_i32_18 = arith.constant 0 : i32
    %29 = arith.cmpi ne, %28, %c0_i32_18 : i32
    scf.if %29 {
      %c0_19 = arith.constant 0 : index
      %c0_20 = arith.constant 0 : index
      %30 = vector.load %arg8[%c0_19, %c0_20] : memref<8x32xf32, #tpu.memory_space<vmem>>, vector<8x32xf32>
      %c0_21 = arith.constant 0 : index
      %c0_22 = arith.constant 0 : index
      %31 = vector.load %arg7[%c0_21, %c0_22] : memref<8x32xf32, #tpu.memory_space<vmem>>, vector<8x32xf32>
      tpu.vector_store %arg7[%c0_21, %c0_22], %30 {strides = array<i32>} : memref<8x32xf32, #tpu.memory_space<vmem>>, vector<8x32xf32>,
    } else {
    }
    return
  }
  func.func @transform_0(%arg0: i32, %arg1: i32) -> (i32, i32) {
    %c0_i32 = arith.constant 0 : i32
    %c0_i32_0 = arith.constant 0 : i32
    return %arg0, %c0_i32 : i32, i32
  }
  func.func @transform_1(%arg0: i32, %arg1: i32) -> (i32, i32) {
    %c0_i32 = arith.constant 0 : i32
    %c0_i32_0 = arith.constant 0 : i32
    return %c0_i32, %arg1 : i32, i32
  }
  func.func @transform_2(%arg0: i32, %arg1: i32) -> (i32, i32) {
    %c0_i32 = arith.constant 0 : i32
    %c0_i32_0 = arith.constant 0 : i32
    return %c0_i32, %arg1 : i32, i32
  }
  func.func @transform_3(%arg0: i32, %arg1: i32) -> (i32, i32) {
    %c0_i32 = arith.constant 0 : i32
    %c0_i32_0 = arith.constant 0 : i32
    return %arg1, %c0_i32 : i32, i32
  }
  func.func @transform_4(%arg0: i32, %arg1: i32) -> (i32, i32) {
    %c0_i32 = arith.constant 0 : i32
    %c0_i32_0 = arith.constant 0 : i32
    %c0_i32_1 = arith.constant 0 : i32
    return %c0_i32, %c0_i32_0 : i32, i32
  }
  func.func @transform_5(%arg0: i32, %arg1: i32) -> (i32, i32) {
    %c0_i32 = arith.constant 0 : i32
    %c0_i32_0 = arith.constant 0 : i32
    return %arg0, %c0_i32 : i32, i32
  }
}

</mosaic_0001>

<bundles_post_ra>
// kernel: tpu_custom_call.1
= control target key start
LH: loop header
LB: loop body
LE: loop exit
PB: predicated region body
PF: predicated region fallthrough
CT: control target
= control target key end

     0   :  { %10 = vsyncpa [#allocation4], 0  ;;  %s1062_s0 = inlined_call_operand.vmem [shape: f32[16,32], index: 0, kind: input, shape index: {}]   ;;  %s1063_s1 = inlined_call_operand.vmem [shape: f32[32,128], index: 1, kind: input, shape index: {}]   ;;  %s1064_s2 = inlined_call_operand.vmem [shape: f32[1,128], index: 2, kind: input, shape index: {}]   ;;  %s1065_s3 = inlined_call_operand.vmem [shape: f32[128,32], index: 3, kind: input, shape index: {}]   ;;  %s1066_s4 = inlined_call_operand.vmem [shape: f32[1,32], index: 4, kind: input, shape index: {}]   ;;  %s1067_s5 = inlined_call_operand.hbm [shape: f32[16,32], index: 5, kind: output, shape index: {}]  }
   0x1   :  { %12 = vsyncpa [#allocation4 + $0x1], 0  ;;  %s865_s18 = smov 0   ;;  %s867_s19 = smov 0  }
   0x2   :  { %s869_s20 = smov 0   ;;  %s871_s21 = smov 0  }
   0x3   :  { %s873_s22 = smov 0   ;;  %s875_s23 = smov 0  }
   0x4 LB: > { %s610_s24 = sadd.s32 4294967295, %s830_s23   ;;  %s611_s25 = sadd.s32 4294967294, %s830_s23   ;;  %s830_s23 = sphi %s875_s23, %s18_s23   ;;  %s826_s22 = sphi %s873_s22, %s1074_s22   ;;  %s822_s21 = sphi %s871_s21, %s1073_s21   ;;  %s818_s20 = sphi %s869_s20, %s1072_s20   ;;  %s814_s19 = sphi %s867_s19, %s1071_s19   ;;  %s810_s18 = sphi %s865_s18, %s1070_s18  }
   0x5   : > { %s30_s26 = sadd.s32 1, %s826_s22  ;;  %s162_s27 = sadd.s32 1, %s818_s20 }
   0x6   : > { %p32_p0 = scmp.ge.s32.totalorder %s30_s26, 2  ;;  %p172_p1 = scmp.ne.s32.totalorder %s818_s20, %s814_s19 }
   0x7   : > { %p173_p2 = scmp.eq.s32.totalorder %s610_s24, 1  ;;  %p178_p3 = scmp.ne.s32.totalorder %s814_s19, %s810_s18 }
   0x8   : > { %s1076_s26 = smov (%p32_p0, %s30_s26), 0  ;;  %p179_p5 = scmp.eq.s32.totalorder %s611_s25, 1 }
   0x9   : > { %p905_p4 = por %p173_p2, %p172_p1  ;;  %s159_s29 = ssub.s32 %s826_s22, %s1076_s26 }
   0xa   : > { %p617_p6 = scmp.ge.s32.totalorder %s830_s23, 1  ;;  %p160_p7 = scmp.eq.s32.totalorder %s159_s29, 0 }
   0xb   : > { %p912_p8 = por %p179_p5, %p178_p3  ;;  %p229_p9 = scmp.lt.s32.totalorder %s830_s23, 3 }
   0xc   : > { %s918_s6 = scalar_select %p160_p7, %s818_s20, %s162_s27  }
   0xd   : > { %p230_p10 = pnand %p617_p6, %p229_p9 }
   0xe   : > { %p268_p11 = scmp.lt.s32.totalorder (!%p230_p10), %s822_s21, 1  ;;  %s265_s11 = sand.u32 (!%p230_p10), 1, %s814_s19  }
   0xf   : > { %233 = sbr.rel (%p230_p10) target bundleno = 468 (0x1d4), region = 40  ;;  %s618_s12 = sshll.u32 (!%p230_p10), %s265_s11, 3 }
  0x10   : > { %s267_s14 = scalar_lea.vmem (!%p230_p10), [#allocation3], %s618_s12  ;;  %s488_s25 = scalar_lea.sflag (!%p230_p10), [#allocation4], %s265_s11 }
  0x11   : > { %s501_s15 = sshll.u32 (!%p230_p10), %s267_s14, 4  ;;  %s502_s15 = int_to_ptr.vmem [resolvable:$true] %s501_s15 }
  0x12   : > { %s754_s27 = scalar_lea.vmem (!%p230_p10), %s502_s15, 128 }
  0x13   : > { %p755_p12 = scmp.ne.s32.totalorder (!%p230_p10), %s502_s15, %s754_s27 }
  0x14   : > { %v302_v0 = vld [vmem:[%s1063_s1 + $0x18] sm:$0xff]  ;;  %v832_v1 = vmov 0.0   ;;  %v301_v2 = vld [vmem:[%s1063_s1 + $0x10] sm:$0xff]  ;;  %vm833_vm0 = vmmov 0   ;;  %v620_v3 = vld [vmem:[%s1066_s4] ss:$0 sm:$0xff] }
  0x15   : > { %649 = vmatprep.subr.mxu0 %v832_v1  ;;  %657 = vmatprep.mubr.msk.f32.mxu0 %vm833_vm0, %v832_v1  ;;  %vm296_vm1 = vcmask 261120   ;;  %s269_s13 = scalar_select %p268_p11, %s822_s21, 1  ;;  %v300_v4 = vld [vmem:[%s1063_s1 + $0x8] sm:$0xff]  ;;  %v299_v5 = vld [vmem:[%s1063_s1] sm:$0xff]  ;;  %v409_v7 = vld [vmem:[%s1065_s3 + $0x78] sm:$0xff] }
  0x16   : > { %650 = vmatpush3.msra.mxu0 %v302_v0  ;;  %297 = vst.msk [vmem:[#allocation2] sm:$0xff] %vm296_vm1, %v620_v3  ;;  %660 = vmatprep.subr.mxu1 %v832_v1  ;;  %v408_v8 = vld [vmem:[%s1065_s3 + $0x70] sm:$0xff]  ;;  %v407_v9 = vld [vmem:[%s1065_s3 + $0x68] sm:$0xff]  ;;  %v406_v10 = vld [vmem:[%s1065_s3 + $0x60] sm:$0xff]  ;;  %p756_p13 = pnand %p755_p12, %p905_p4 }
  0x17   : > { %651 = vmatprep.subr.mxu0 %v832_v1  ;;  %692 = vmatprep.mubr.msk.f32.mxu1 %vm833_vm0, %v832_v1  ;;  %s619_s16 = sshll.u32 %s269_s13, 3  ;;  %v405_v11 = vld [vmem:[%s1065_s3 + $0x58] sm:$0xff]  ;;  %v404_v12 = vld [vmem:[%s1065_s3 + $0x50] sm:$0xff]  ;;  %v403_v13 = vld [vmem:[%s1065_s3 + $0x48] sm:$0xff]  ;;  %s624_s13 = sshll.u32 %s822_s21, 7 }
  0x18   : > { %652 = vmatpush3.msra.mxu0 %v301_v2  ;;  %s271_s29 = scalar_lea.vmem %s1062_s0, %s619_s16  ;;  %661 = vmatpush3.msra.mxu1 %v409_v7  ;;  %v402_v14 = vld [vmem:[%s1065_s3 + $0x40] sm:$0xff]  ;;  %v401_v15 = vld [vmem:[%s1065_s3 + $0x38] sm:$0xff]  ;;  %v400_v16 = vld [vmem:[%s1065_s3 + $0x30] sm:$0xff]  ;;  %s1021_s24 = scalar_lea.hbm %s1067_s5, %s624_s13 }
  0x19   : > { %653 = vmatprep.subr.mxu0 %v832_v1  ;;  %v298_v6 = vld [vmem:[%s271_s29] sm:$0xff]  ;;  %662 = vmatprep.subr.mxu1 %v832_v1  ;;  %v399_v17 = vld [vmem:[%s1065_s3 + $0x28] sm:$0xff]  ;;  %v397_v19 = vld [vmem:[%s1065_s3 + $0x18] sm:$0xff]  ;;  %p757_p0 = pneg %p756_p13  ;;  %s834_s29 = smov [#allocation3]  }
  0x1a   : > { %654 = vmatpush3.msra.mxu0 %v300_v4  ;;  %663 = vmatpush3.msra.mxu1 %v408_v8  ;;  %v398_v18 = vld [vmem:[%s1065_s3 + $0x20] sm:$0xff]  ;;  %v396_v20 = vld [vmem:[%s1065_s3 + $0x10] sm:$0xff]  ;;  %v395_v21 = vld [vmem:[%s1065_s3 + $0x8] sm:$0xff]  ;;  %s758_s7 = sshll.u32 %s834_s29, 4  ;;  %s759_s7 = int_to_ptr.vmem [resolvable:$false] %s758_s7 }
  0x1b   : > { %655 = vmatprep.subr.mxu0 %v832_v1  ;;  %664 = vmatprep.subr.mxu1 %v832_v1  ;;  %v394_v22 = vld [vmem:[%s1065_s3] sm:$0xff]  ;;  %s760_s21 = scalar_lea.vmem %s759_s7, 256  ;;  %p761_p1 = scmp.lt.s32.totalorder %s502_s15, %s759_s7 }
  0x1c   : > { %656 = vmatpush3.msra.mxu0 %v299_v5  ;;  %665 = vmatpush3.msra.mxu1 %v407_v9  ;;  %v621_v23 = vld [vmem:[%s1064_s2] ss:$0 sm:$0xff]  ;;  %p762_p2 = scmp.lt.s32.totalorder %s760_s21, %s754_s27 }
  0x1d   : > { %658 = vmatmul.mubr.msk.f32.vlgmr.msra.gmra.mxu0 %vm296_vm1, %v298_v6  ;;  %666 = vmatprep.subr.mxu1 %v832_v1  ;;  %v393_v36 = vld [vmem:[#allocation2] sm:$0xff] }
  0x1e   : > { %667 = vmatpush3.msra.mxu1 %v406_v10  ;;  %p763_p3 = por %p762_p2, %p761_p1 }
  0x1f   : > { %668 = vmatprep.subr.mxu1 %v832_v1 }
  0x20   : > { %669 = vmatpush3.msra.mxu1 %v405_v11  ;;  %p764_p5 = pnand %p763_p3, %p757_p0 }
  0x21   : > { %670 = vmatprep.subr.mxu1 %v832_v1 }
  0x22   : > { %671 = vmatpush3.msra.mxu1 %v404_v12 }
  0x23   : > { %672 = vmatprep.subr.mxu1 %v832_v1 }
  0x24   : > { %673 = vmatpush3.msra.mxu1 %v403_v13 }
  0x25   : > { %674 = vmatprep.subr.mxu1 %v832_v1 }
  0x26   : > { %675 = vmatpush3.msra.mxu1 %v402_v14 }
  0x27   : > { %676 = vmatprep.subr.mxu1 %v832_v1 }
  0x28   : > { %677 = vmatpush3.msra.mxu1 %v401_v15 }
  0x29   : > { %678 = vmatprep.subr.mxu1 %v832_v1 }
  0x2a   : > { %679 = vmatpush3.msra.mxu1 %v400_v16 }
  0x2b   : > { %680 = vmatprep.subr.mxu1 %v832_v1 }
  0x2c   : > { %681 = vmatpush3.msra.mxu1 %v399_v17 }
  0x2d   : > { %682 = vmatprep.subr.mxu1 %v832_v1 }
  0x2e   : > { %683 = vmatpush3.msra.mxu1 %v398_v18 }
  0x2f   : > { %684 = vmatprep.subr.mxu1 %v832_v1 }
  0x30   : > { %685 = vmatpush3.msra.mxu1 %v397_v19 }
  0x31   : > { %686 = vmatprep.subr.mxu1 %v832_v1 }
  0x32   : > { %687 = vmatpush3.msra.mxu1 %v396_v20 }
  0x33   : > { %688 = vmatprep.subr.mxu1 %v832_v1 }
  0x34   : > { %689 = vmatpush3.msra.mxu1 %v395_v21 }
  0x35   : > { %690 = vmatprep.subr.mxu1 %v832_v1 }
  0x36   : > { %691 = vmatpush3.msra.mxu1 %v394_v22 }
  0xdd   : > { %v380_v24 = vpop.f32.mrf.mxu0 }
  0xde   : > { %v381_v25 = vadd.f32 %v621_v23, %v380_v24 }
  0xdf   : > { %v659_v26 = vpop.f32.mrf.mxu0 }
  0xe0   : > { %v385_v27 = vmul.f32 0.044715, %v381_v25  ;;  %v384_v33 = vmul.f32 0.5, %v381_v25 }
  0xe2   : > { %v386_v28 = vmul.f32 %v385_v27, %v381_v25 }
  0xe4   : > { %v387_v29 = vmul.f32 %v386_v28, %v381_v25 }
  0xe6   : > { %v388_v30 = vadd.f32 %v387_v29, %v381_v25 }
  0xe8   : > { %v389_v31 = vmul.f32 0.7978846, %v388_v30 }
  0xea   : > { %752 = vtanh.f32 %v389_v31 }
  0xf7   : > { %v753_v32 = vpop.eup %752 }
  0xf8   : > { %v391_v34 = vadd.f32 1.0, %v753_v32 }
  0xfa   : > { %v392_v35 = vmul.f32 %v391_v34, %v384_v33 }
  0xfc   : > { %693 = vmatmul.mubr.f32.vlgmr.msra.gmra.mxu1 %v392_v35 }
 0x1bc   : > { %v476_v37 = vpop.f32.mrf.mxu1 }
 0x1bd   : > { %v480_v38 = vadd.f32 %v476_v37, %v393_v36 }
 0x1be   : > { %v694_v39 = vpop.f32.mrf.mxu1 }
 0x1bf   : > { %481 = vst.msk [vmem:[#allocation2] sm:$0xff] %vm296_vm1, %v480_v38 }
 0x1c6   : > { %v485_v40 = vld [vmem:[#allocation2] sm:$0xff] }
 0x1c7   : > { %486 = vst.msk [vmem:[%s267_s14] sm:$0xff] %vm296_vm1, %v485_v40 }
 0x1c8   : > { %767 = shalt.err (!%p764_p5)
}
 0x1c9   : > { %s768_s8 = scalar_lea.hbm %s1021_s24, 128  ;;  %s772_s11 = scalar_lea.hbm %s1067_s5, 256 }
 0x1ca   : > { %p769_p6 = scmp.ne.s32.totalorder %s1021_s24, %s768_s8  ;;  %p773_p10 = scmp.lt.s32.totalorder %s1021_s24, %s1067_s5 }
 0x1cb   : > { %p774_p11 = scmp.lt.s32.totalorder %s772_s11, %s768_s8 }
 0x1cc   : > { %p770_p7 = pnand %p769_p6, %p905_p4 }
 0x1cd   : > { %p775_p12 = por %p774_p11, %p773_p10 }
 0x1ce   : > { %p771_p9 = pneg %p770_p7 }
 0x1d0   : > { %p776_p13 = pnand %p775_p12, %p771_p9 }
 0x1d2   : > { %779 = shalt.err (!%p776_p13)
}
 0x1d3   : > { %695 = dma.vmem_to_hbm [thread:$0]  (%p905_p4), %s502_s15, 128, %s1021_s24, %s488_s25  }
 0x1d4 PF: > { %p701_p0 = scmp.ge.s32.totalorder %s830_s23, 2  ;;  %s513_s14 = sand.u32 1, %s810_s18  }
 0x1d5   : > { %s514_s16 = scalar_lea.sflag [#allocation4], %s513_s14 }
 0x1d6   : > { %p698_p1 = pnand %p701_p0, %p912_p8 }
 0x1d8   : > { %p699_p2 = pneg %p698_p1 }
 0x1da   : > { %805 = dma.done.wait (%p699_p2), %s514_s16, 128  }
 0x1db   : > { %807 = vsyncadd (%p699_p2), %s514_s16, 4294967168  ;;  %s18_s23 = sadd.s32 1, %s830_s23   ;;  %s1070_s18 = smov %s814_s19 }
 0x1dc   : > { %p15_p3 = scmp.ge.s32.totalorder %s18_s23, 4   ;;  %s1071_s19 = smov %s818_s20 }
 0x1dd   : > { %s1072_s20 = smov %s918_s6  ;;  %s1073_s21 = smov %s826_s22 }
 0x1de   : > { %s1074_s22 = smov %s1076_s26  ;;  %17 = sbr.rel (!%p15_p3) target bundleno = 4 (0x4), region = 92 }
 0x1e3   :  { %519 = vsyncpa [#allocation4], 1 }
 0x1e4   :  { %521 = vsyncpa [#allocation4 + $0x1], 1 }

</bundles_post_ra>
